<compile_context>
chip_gen: v5e
topology: v5e:2x2
jax: 0.10.0
libtpu: 0.0.40
codegen_flags: <defaults>
</compile_context>

<pallas_src>
import jax
import jax.numpy as jnp
from jax.experimental import pallas as pl
from jax.experimental.pallas import tpu as pltpu

GENERATOR_PARAM = 100
VOCAB_SIZE = 2000
BN_EPS = 1e-5
MAX_TB = 512   # keeps double-buffered f32 output block under v5e's 16 MiB scoped VMEM


def _round_up(x, m):
    return (x + m - 1) // m * m


def _cdiv(a, b):
    return (a + b - 1) // b


def _generator_kernel(x_ref, scale_ref, shift_ref, w_ref, b_ref, o_ref):
    # x_ref:     (TB, D)  noise chunk (f32)
    # scale_ref: (1, D)   folded BN scale = gamma * rsqrt(var + eps)
    # shift_ref: (1, D)   folded BN shift = beta - mean * scale
    # w_ref:     (D, V)   linear weight, pre-transposed, bf16 (resident)
    # b_ref:     (1, V)   linear bias (f32, resident)
    # o_ref:     (TB, V)  softmax probabilities (f32)

    # BatchNorm (full-batch stats precomputed in the wrapper, folded to affine).
    x_bn = x_ref[...] * scale_ref[...] + shift_ref[...]          # (TB, D) f32

    # Linear: bf16 MXU matmul with f32 accumulation, then add bias.
    logits = jnp.dot(x_bn.astype(jnp.bfloat16), w_ref[...],
                     preferred_element_type=jnp.float32) + b_ref[...]

    # Numerically stable softmax over the vocab (lane) axis; exact divide for
    # PyTorch parity (TB per-row divides are negligible vs. the (TB, V) work).
    m = jnp.max(logits, axis=-1, keepdims=True)
    e = jnp.exp(logits - m)
    denom = jnp.sum(e, axis=-1, keepdims=True)
    o_ref[...] = (e / denom).astype(o_ref.dtype)


def _choose_tb(batch):
    """Batch tile: <= MAX_TB, >= 2 grid steps when batch > 8, minimal padding."""
    if batch <= 8:
        return _round_up(batch, 8)
    n_chunks = max(2, _cdiv(batch, MAX_TB))
    return _round_up(_cdiv(batch, n_chunks), 8)


def generator_forward(noise, w_bf16_t, bias_row, gamma, beta):
    """Forward pass of the generator.

    noise:      (B, D) f32
    w_bf16_t:   (D, V) bf16 -- Linear weight, pre-transposed vs. PyTorch (out,in)
    bias_row:   (1, V) f32  -- Linear bias
    gamma/beta: (D,)   f32  -- BatchNorm1d affine parameters
    Returns (B, V) f32 softmax probabilities.
    """
    B, D = noise.shape
    V = w_bf16_t.shape[1]

    # --- BatchNorm1d training-mode statistics (full batch, biased variance) ---
    # Hoisted to the wrapper so the batch axis can be gridded in the kernel.
    # TODO(synk): eval-mode (running-stats) BatchNorm is not implemented; this
    # matches PyTorch's training-mode forward (module default).
    mean = jnp.mean(noise, axis=0)
    var = jnp.mean(jnp.square(noise - mean[None, :]), axis=0)
    inv_std = jax.lax.rsqrt(var + BN_EPS)
    scale = (gamma * inv_std).reshape(1, D)
    shift = (beta - mean * gamma * inv_std).reshape(1, D)

    # --- Batch tiling (only the batch axis is ever padded) ---
    TB = _choose_tb(B)
    grid_b = _cdiv(B, TB)
    Bp = grid_b * TB
    x_in = noise if Bp == B else jnp.pad(noise, ((0, Bp - B), (0, 0)))

    out = pl.pallas_call(
        _generator_kernel,
        out_shape=jax.ShapeDtypeStruct((Bp, V), jnp.float32),
        grid=(grid_b,),
        in_specs=[
            pl.BlockSpec((TB, D), lambda i: (i, 0)),   # noise: batch-chunked
            pl.BlockSpec((1, D), lambda i: (0, 0)),    # BN scale: resident
            pl.BlockSpec((1, D), lambda i: (0, 0)),    # BN shift: resident
            pl.BlockSpec((D, V), lambda i: (0, 0)),    # weight: resident
            pl.BlockSpec((1, V), lambda i: (0, 0)),    # bias: resident
        ],
        out_specs=pl.BlockSpec((TB, V), lambda i: (i, 0)),
        compiler_params=pltpu.CompilerParams(
            dimension_semantics=("parallel",)),
    )(x_in, scale, shift, w_bf16_t, bias_row)

    return out if Bp == B else out[:B]


def init_params(key):
    # Deterministic synthetic parameters matching nn.Linear(100, 2000) and
    # nn.BatchNorm1d(100) default-initialized affine params.  The weight is
    # transposed to (in, out) and cast to bf16 ONCE here (hoisted out of the
    # per-call path); the bias is stored as a (1, V) row.
    kw, kb = jax.random.split(key)
    bound = 1.0 / jnp.sqrt(jnp.float32(GENERATOR_PARAM))
    w_t = jax.random.uniform(kw, (GENERATOR_PARAM, VOCAB_SIZE),
                             jnp.float32, -bound, bound)
    bias = jax.random.uniform(kb, (VOCAB_SIZE,), jnp.float32, -bound, bound)
    gamma = jnp.ones((GENERATOR_PARAM,), jnp.float32)
    beta = jnp.zeros((GENERATOR_PARAM,), jnp.float32)
    return w_t.astype(jnp.bfloat16), bias.reshape(1, VOCAB_SIZE), gamma, beta


if __name__ == "__main__":
    key = jax.random.PRNGKey(0)
    k_noise, k_params = jax.random.split(key)

    batch = 8
    noise = jax.random.normal(k_noise, (batch, GENERATOR_PARAM), jnp.float32)
    w_bf16_t, bias_row, gamma, beta = init_params(k_params)

    fwd = jax.jit(generator_forward)
    out = fwd(noise, w_bf16_t, bias_row, gamma, beta)
    out = jax.block_until_ready(out)

    # Sanity: shape, finiteness, softmax rows sum to 1 (bf16 weights give
    # ~1e-3 relative slack on logits; exact divide keeps row sums ~1).
    assert out.shape == (batch, VOCAB_SIZE)
    assert bool(jnp.all(jnp.isfinite(out)))
    row_sums = jnp.sum(out, axis=-1)
    assert bool(jnp.all(jnp.abs(row_sums - 1.0) < 1e-3))

    print("KERNEL_OK")
</pallas_src>

<mosaic_0001>
module attributes {stable_mosaic.version = 11 : i64} {
  func.func @_generator_kernel(%arg0: i32, %arg1: memref<8x100xf32, #tpu.memory_space<vmem>>, %arg2: memref<1x100xf32, #tpu.memory_space<vmem>>, %arg3: memref<1x100xf32, #tpu.memory_space<vmem>>, %arg4: memref<100x2000xbf16, #tpu.memory_space<vmem>>, %arg5: memref<1x2000xf32, #tpu.memory_space<vmem>>, %arg6: memref<8x2000xf32, #tpu.memory_space<vmem>>) attributes {dimension_semantics = [#tpu.dimension_semantics<parallel>], iteration_bounds = array<i64: 1>, scalar_prefetch = 0 : i64, scratch_operands = 0 : i64, tpu.core_type = #tpu.core_type<tc>, window_params = [{transform_indices = @transform_0, window_bounds = array<i64: 8, 100>}, {pipeline_mode = #tpu.pipeline_mode<synchronous>, transform_indices = @transform_1, window_bounds = array<i64: 1, 100>}, {pipeline_mode = #tpu.pipeline_mode<synchronous>, transform_indices = @transform_2, window_bounds = array<i64: 1, 100>}, {pipeline_mode = #tpu.pipeline_mode<synchronous>, transform_indices = @transform_3, window_bounds = array<i64: 100, 2000>}, {pipeline_mode = #tpu.pipeline_mode<synchronous>, transform_indices = @transform_4, window_bounds = array<i64: 1, 2000>}, {transform_indices = @transform_5, window_bounds = array<i64: 8, 2000>}]} {
    %c0 = arith.constant 0 : index
    %c0_0 = arith.constant 0 : index
    %0 = vector.load %arg1[%c0, %c0_0] : memref<8x100xf32, #tpu.memory_space<vmem>>, vector<8x100xf32>
    %c0_1 = arith.constant 0 : index
    %c0_2 = arith.constant 0 : index
    %1 = vector.load %arg2[%c0_1, %c0_2] : memref<1x100xf32, #tpu.memory_space<vmem>>, vector<1x100xf32>
    %2 = vector.broadcast %1 : vector<1x100xf32> to vector<8x100xf32>
    %3 = arith.mulf %0, %2 : vector<8x100xf32>
    %c0_3 = arith.constant 0 : index
    %c0_4 = arith.constant 0 : index
    %4 = vector.load %arg3[%c0_3, %c0_4] : memref<1x100xf32, #tpu.memory_space<vmem>>, vector<1x100xf32>
    %5 = vector.broadcast %4 : vector<1x100xf32> to vector<8x100xf32>
    %6 = arith.addf %3, %5 : vector<8x100xf32>
    %7 = arith.truncf %6 : vector<8x100xf32> to vector<8x100xbf16>
    %c0_5 = arith.constant 0 : index
    %c0_6 = arith.constant 0 : index
    %8 = vector.load %arg4[%c0_5, %c0_6] : memref<100x2000xbf16, #tpu.memory_space<vmem>>, vector<100x2000xbf16>
    %cst = arith.constant dense<0.000000e+00> : vector<8x2000xf32>
    %9 = tpu.matmul %7, %8, %cst {dimension_numbers = #tpu.dot_dimension_numbers<[1], [0], [0], [1], [0, 0, 1, 1], [], []>} : vector<8x100xbf16>, vector<100x2000xbf16>, vector<8x2000xf32> -> vector<8x2000xf32>
    %c0_7 = arith.constant 0 : index
    %c0_8 = arith.constant 0 : index
    %10 = vector.load %arg5[%c0_7, %c0_8] : memref<1x2000xf32, #tpu.memory_space<vmem>>, vector<1x2000xf32>
    %11 = vector.broadcast %10 : vector<1x2000xf32> to vector<8x2000xf32>
    %12 = arith.addf %9, %11 : vector<8x2000xf32>
    %cst_9 = arith.constant dense<0xFF800000> : vector<8xf32>
    %13 = vector.multi_reduction <maximumf>, %12, %cst_9 [1] : vector<8x2000xf32> to vector<8xf32>
    %14 = vector.shape_cast %13 : vector<8xf32> to vector<8x1xf32>
    %15 = vector.broadcast %14 : vector<8x1xf32> to vector<8x2000xf32>
    %16 = arith.subf %12, %15 : vector<8x2000xf32>
    %17 = math.exp %16 : vector<8x2000xf32>
    %cst_10 = arith.constant dense<0.000000e+00> : vector<8xf32>
    %18 = vector.multi_reduction <add>, %17, %cst_10 [1] : vector<8x2000xf32> to vector<8xf32>
    %19 = vector.shape_cast %18 : vector<8xf32> to vector<8x1xf32>
    %20 = vector.broadcast %19 : vector<8x1xf32> to vector<8x2000xf32>
    %21 = arith.divf %17, %20 : vector<8x2000xf32>
    %c0_11 = arith.constant 0 : index
    %c0_12 = arith.constant 0 : index
    %22 = vector.load %arg6[%c0_11, %c0_12] : memref<8x2000xf32, #tpu.memory_space<vmem>>, vector<8x2000xf32>
    tpu.vector_store %arg6[%c0_11, %c0_12], %21 {strides = array<i32>} : memref<8x2000xf32, #tpu.memory_space<vmem>>, vector<8x2000xf32>,
    return
  }
  func.func @transform_0(%arg0: i32) -> (i32, i32) {
    %c0_i32 = arith.constant 0 : i32
    %c0_i32_0 = arith.constant 0 : i32
    return %arg0, %c0_i32 : i32, i32
  }
  func.func @transform_1(%arg0: i32) -> (i32, i32) {
    %c0_i32 = arith.constant 0 : i32
    %c0_i32_0 = arith.constant 0 : i32
    %c0_i32_1 = arith.constant 0 : i32
    return %c0_i32, %c0_i32_0 : i32, i32
  }
  func.func @transform_2(%arg0: i32) -> (i32, i32) {
    %c0_i32 = arith.constant 0 : i32
    %c0_i32_0 = arith.constant 0 : i32
    %c0_i32_1 = arith.constant 0 : i32
    return %c0_i32, %c0_i32_0 : i32, i32
  }
  func.func @transform_3(%arg0: i32) -> (i32, i32) {
    %c0_i32 = arith.constant 0 : i32
    %c0_i32_0 = arith.constant 0 : i32
    %c0_i32_1 = arith.constant 0 : i32
    return %c0_i32, %c0_i32_0 : i32, i32
  }
  func.func @transform_4(%arg0: i32) -> (i32, i32) {
    %c0_i32 = arith.constant 0 : i32
    %c0_i32_0 = arith.constant 0 : i32
    %c0_i32_1 = arith.constant 0 : i32
    return %c0_i32, %c0_i32_0 : i32, i32
  }
  func.func @transform_5(%arg0: i32) -> (i32, i32) {
    %c0_i32 = arith.constant 0 : i32
    %c0_i32_0 = arith.constant 0 : i32
    return %arg0, %c0_i32 : i32, i32
  }
}

</mosaic_0001>

<bundles_post_ra>
// kernel: generator_forward.1
= control target key start
LH: loop header
LB: loop body
LE: loop exit
PB: predicated region body
PF: predicated region fallthrough
CT: control target
= control target key end

     0   :  { %10 = vsyncpa [#allocation3], 0  ;;  %s1933_s0 = inlined_call_operand.vmem [shape: f32[8,100], index: 0, kind: input, shape index: {}]   ;;  %s1934_s1 = inlined_call_operand.vmem [shape: f32[1,100], index: 1, kind: input, shape index: {}]   ;;  %s1935_s2 = inlined_call_operand.vmem [shape: f32[1,100], index: 2, kind: input, shape index: {}]   ;;  %s1936_s3 = inlined_call_operand.hbm [shape: bf16[100,2000], index: 3, kind: input, shape index: {}]   ;;  %s1937_s4 = inlined_call_operand.hbm [shape: f32[1,2000], index: 4, kind: input, shape index: {}]   ;;  %s1938_s5 = inlined_call_operand.hbm [shape: f32[8,2000], index: 5, kind: output, shape index: {}]  }
   0x1   :  { %11 = vsyncpa [#allocation6], 0 }
   0x2   :  { %12 = vsyncpa [#allocation4], 0  ;;  %s23_s20 = sshll.u32 %s1936_s3, 4  ;;  %s1749_s21 = smov [#allocation2]   ;;  %s24_s20 = int_to_ptr.hbm [resolvable:$true] %s23_s20 }
   0x3   :  { %s25_s22 = sshll.u32 %s1749_s21, 4  ;;  %s37_s25 = sshll.u32 %s1937_s4, 4  ;;  %s26_s22 = int_to_ptr.vmem [resolvable:$true] %s25_s22  ;;  %s38_s25 = int_to_ptr.hbm [resolvable:$true] %s37_s25 }
   0x4   :  { %s1750_s26 = smov 1024   ;;  %s1751_s27 = smov 64  }
   0x5   :  { %31 = dma.hbm_to_vmem [thread:$0]  %s24_s20, 13312, %s26_s22, [#allocation3], %s1750_s26, %s1750_s26, %s1751_s27  }
   0x6   :  { %s1752_s28 = smov [#allocation5]  }
   0x7   :  { %s39_s29 = sshll.u32 %s1752_s28, 4  ;;  %s40_s29 = int_to_ptr.vmem [resolvable:$true] %s39_s29 }
   0x8   :  { %42 = dma.hbm_to_vmem [thread:$0]  %s38_s25, 256, %s40_s29, [#allocation6]  }
   0x9   :  { %1743 = dma.done.wait [#allocation3], 13312  }
   0xa   :  { %1744 = vsyncadd [#allocation3], 4294953984 }
   0xb   :  { %1745 = dma.done.wait [#allocation6], 256  }
   0xc   :  { %1746 = vsyncadd [#allocation6], 4294967040  ;;  %v160_v0 = vld [vmem:[#allocation2 + $0x300] sm:$0x33]  ;;  %v161_v1 = vld [vmem:[#allocation2 + $0x308] sm:$0x33] }
   0xd   :  { %v500_v2 = vunpack.c.l.b16 %v160_v0  ;;  %v501_v3 = vunpack.c.h.b16 %v160_v0  ;;  %v502_v4 = vunpack.c.l.b16 %v161_v1  ;;  %v503_v5 = vunpack.c.h.b16 %v161_v1  ;;  %v1456_v6 = vld [vmem:[#allocation2 + $0x280] sm:$0xf]  ;;  %v1614_v12 = vld [vmem:[#allocation2 + $0x284] sm:$0xf]  ;;  %v1464_v14 = vld [vmem:[#allocation2 + $0x288] sm:$0xf] }
   0xe   :  { %vm728_vm0 = vcmask 1041408   ;;  %v1622_v7 = vld [vmem:[#allocation2 + $0x2bc] sm:$0xf0]  ;;  %v1458_v13 = vld [vmem:[#allocation2 + $0x2c0] sm:$0xf0]  ;;  %vm724_vm1 = vcmask 818176  }
   0xf   :  { %v612_v8 = vpack.c.b16 %v500_v2, %v500_v2  ;;  %v613_v9 = vpack.c.b16 %v501_v3, %v501_v3  ;;  %v614_v10 = vpack.c.b16 %v502_v4, %v502_v4  ;;  %v615_v11 = vpack.c.b16 %v503_v5, %v503_v5  ;;  %v1623_v15 = vld [vmem:[#allocation2 + $0x2c4] sm:$0xf0]  ;;  %v1615_v16 = vld [vmem:[#allocation2 + $0x28c] sm:$0xf]  ;;  %v1392_v24 = vld [vmem:[#allocation2 + $0x200] sm:$0xf] }
  0x10   :  { %v1466_v17 = vld [vmem:[#allocation2 + $0x2c8] sm:$0xf0]  ;;  %v1457_v22 = vor.u32 %v1622_v7, %v1456_v6  ;;  %v1461_v23 = vor.u32 %v1614_v12, %v1458_v13  ;;  %v1606_v25 = vld [vmem:[#allocation2 + $0x23c] sm:$0xf0]  ;;  %v1465_v26 = vor.u32 %v1623_v15, %v1464_v14  ;;  %v1598_v28 = vld [vmem:[#allocation2 + $0x204] sm:$0xf] }
  0x11   :  { %v730_v18 = vsel %vm728_vm0, %v612_v8, 0  ;;  %v733_v19 = vsel %vm728_vm0, %v613_v9, 0  ;;  %v736_v20 = vsel %vm728_vm0, %v614_v10, 0  ;;  %v739_v21 = vsel %vm728_vm0, %v615_v11, 0  ;;  %v1394_v29 = vld [vmem:[#allocation2 + $0x240] sm:$0xf0] }
  0x12   :  { %778 = vmatpush.bf16.msra.mxu0 %v730_v18  ;;  %791 = vmatpush.bf16.msra.mxu1 %v733_v19  ;;  %v1469_v27 = vor.u32 %v1615_v16, %v1466_v17  ;;  %v1400_v30 = vld [vmem:[#allocation2 + $0x208] sm:$0xf]  ;;  %v1599_v32 = vld [vmem:[#allocation2 + $0x20c] sm:$0xf]  ;;  %v1393_v34 = vor.u32 %v1606_v25, %v1392_v24  ;;  %v1397_v35 = vor.u32 %v1598_v28, %v1394_v29  ;;  %v1328_v36 = vld [vmem:[#allocation2 + $0x180] sm:$0xf] }
  0x13   :  { %804 = vmatpush.bf16.msra.mxu2 %v736_v20  ;;  %817 = vmatpush.bf16.msra.mxu3 %v739_v21  ;;  %v1607_v31 = vld [vmem:[#allocation2 + $0x244] sm:$0xf0]  ;;  %v1402_v33 = vld [vmem:[#allocation2 + $0x248] sm:$0xf0]  ;;  %v1590_v37 = vld [vmem:[#allocation2 + $0x1bc] sm:$0xf0] }
  0x14   :  { %v1401_v38 = vor.u32 %v1607_v31, %v1400_v30  ;;  %v1405_v39 = vor.u32 %v1599_v32, %v1402_v33  ;;  %v1582_v40 = vld [vmem:[#allocation2 + $0x184] sm:$0xf]  ;;  %v1336_v42 = vld [vmem:[#allocation2 + $0x188] sm:$0xf]  ;;  %v1583_v44 = vld [vmem:[#allocation2 + $0x18c] sm:$0xf]  ;;  %v1329_v46 = vor.u32 %v1590_v37, %v1328_v36 }
  0x15   :  { %v1330_v41 = vld [vmem:[#allocation2 + $0x1c0] sm:$0xf0]  ;;  %v1591_v43 = vld [vmem:[#allocation2 + $0x1c4] sm:$0xf0]  ;;  %v1338_v45 = vld [vmem:[#allocation2 + $0x1c8] sm:$0xf0] }
  0x16   :  { %779 = vmatpush.bf16.msra.mxu0 %v1457_v22  ;;  %792 = vmatpush.bf16.msra.mxu1 %v1461_v23  ;;  %v1333_v47 = vor.u32 %v1582_v40, %v1330_v41  ;;  %v1264_v48 = vld [vmem:[#allocation2 + $0x100] sm:$0xf]  ;;  %v1337_v50 = vor.u32 %v1591_v43, %v1336_v42  ;;  %v1341_v51 = vor.u32 %v1583_v44, %v1338_v45  ;;  %v1566_v52 = vld [vmem:[#allocation2 + $0x104] sm:$0xf]  ;;  %v1272_v54 = vld [vmem:[#allocation2 + $0x108] sm:$0xf] }
  0x17   :  { %805 = vmatpush.bf16.msra.mxu2 %v1465_v26  ;;  %818 = vmatpush.bf16.msra.mxu3 %v1469_v27  ;;  %v1574_v49 = vld [vmem:[#allocation2 + $0x13c] sm:$0xf0]  ;;  %v1266_v53 = vld [vmem:[#allocation2 + $0x140] sm:$0xf0]  ;;  %v1575_v55 = vld [vmem:[#allocation2 + $0x144] sm:$0xf0] }
  0x18   :  { %v1567_v56 = vld [vmem:[#allocation2 + $0x10c] sm:$0xf]  ;;  %v1200_v58 = vld [vmem:[#allocation2 + $0x80] sm:$0xf]  ;;  %v1265_v59 = vor.u32 %v1574_v49, %v1264_v48  ;;  %v1269_v60 = vor.u32 %v1566_v52, %v1266_v53  ;;  %v1550_v62 = vld [vmem:[#allocation2 + $0x84] sm:$0xf]  ;;  %v1273_v0 = vor.u32 %v1575_v55, %v1272_v54 }
  0x19   :  { %v1274_v57 = vld [vmem:[#allocation2 + $0x148] sm:$0xf0]  ;;  %v1558_v61 = vld [vmem:[#allocation2 + $0xbc] sm:$0xf0]  ;;  %v162_v63 = vld [vmem:[#allocation2 + $0x310] sm:$0x33] }
  0x1a   :  { %780 = vmatpush.bf16.msra.mxu0 %v1393_v34  ;;  %793 = vmatpush.bf16.msra.mxu1 %v1397_v35  ;;  %v1277_v1 = vor.u32 %v1567_v56, %v1274_v57  ;;  %v1202_v2 = vld [vmem:[#allocation2 + $0xc0] sm:$0xf0]  ;;  %v1208_v3 = vld [vmem:[#allocation2 + $0x88] sm:$0xf]  ;;  %v163_v4 = vld [vmem:[#allocation2 + $0x318] sm:$0x33]  ;;  %v504_v10 = vunpack.c.l.b16 %v162_v63  ;;  %v505_v11 = vunpack.c.h.b16 %v162_v63  ;;  %v1201_v12 = vor.u32 %v1558_v61, %v1200_v58 }
  0x1b   :  { %806 = vmatpush.bf16.msra.mxu2 %v1401_v38  ;;  %819 = vmatpush.bf16.msra.mxu3 %v1405_v39  ;;  %v1559_v5 = vld [vmem:[#allocation2 + $0xc4] sm:$0xf0]  ;;  %v1551_v6 = vld [vmem:[#allocation2 + $0x8c] sm:$0xf]  ;;  %v1136_v8 = vld [vmem:[#allocation2] sm:$0xf]  ;;  %v1205_v13 = vor.u32 %v1550_v62, %v1202_v2  ;;  %v506_v17 = vunpack.c.l.b16 %v163_v4  ;;  %v507_v18 = vunpack.c.h.b16 %v163_v4 }
  0x1c   :  { %v1210_v7 = vld [vmem:[#allocation2 + $0xc8] sm:$0xf0]  ;;  %v1542_v9 = vld [vmem:[#allocation2 + $0x3c] sm:$0xf0]  ;;  %v1534_v14 = vld [vmem:[#allocation2 + $0x4] sm:$0xf]  ;;  %v1209_v19 = vor.u32 %v1559_v5, %v1208_v3  ;;  %v616_v28 = vpack.c.b16 %v504_v10, %v504_v10  ;;  %v617_v29 = vpack.c.b16 %v505_v11, %v505_v11 }
  0x1d   :  { %v1138_v15 = vld [vmem:[#allocation2 + $0x40] sm:$0xf0]  ;;  %v1144_v16 = vld [vmem:[#allocation2 + $0x8] sm:$0xf]  ;;  %v1213_v20 = vor.u32 %v1551_v6, %v1210_v7  ;;  %v1535_v22 = vld [vmem:[#allocation2 + $0xc] sm:$0xf]  ;;  %v1137_v26 = vor.u32 %v1542_v9, %v1136_v8  ;;  %v618_v31 = vpack.c.b16 %v506_v17, %v506_v17  ;;  %v619_v32 = vpack.c.b16 %v507_v18, %v507_v18 }
  0x1e   :  { %781 = vmatpush.bf16.msra.mxu0 %v1329_v46  ;;  %794 = vmatpush.bf16.msra.mxu1 %v1333_v47  ;;  %v1543_v21 = vld [vmem:[#allocation2 + $0x44] sm:$0xf0]  ;;  %v52_v23 = vld [vmem:[%s1933_s0] sm:$0xff]  ;;  %v1146_v24 = vld [vmem:[#allocation2 + $0x48] sm:$0xf0]  ;;  %v1141_v27 = vor.u32 %v1534_v14, %v1138_v15  ;;  %v742_v41 = vsel %vm728_vm0, %v616_v28, 0 }
  0x1f   :  { %807 = vmatpush.bf16.msra.mxu2 %v1337_v50  ;;  %820 = vmatpush.bf16.msra.mxu3 %v1341_v51  ;;  %v1635_v25 = vld [vmem:[%s1934_s1] ss:$0 sm:$0xff]  ;;  %v1145_v34 = vor.u32 %v1543_v21, %v1144_v16  ;;  %v1149_v35 = vor.u32 %v1535_v22, %v1146_v24  ;;  %v1472_v36 = vld [vmem:[#allocation2 + $0x290] sm:$0xf]  ;;  %v1616_v38 = vld [vmem:[#allocation2 + $0x294] sm:$0xf] }
  0x20   :  { %v1636_v30 = vld [vmem:[%s1935_s2] ss:$0 sm:$0xff]  ;;  %v57_v33 = vmul.f32 %v1635_v25, %v52_v23  ;;  %v1624_v37 = vld [vmem:[#allocation2 + $0x2cc] sm:$0xf0]  ;;  %v1474_v39 = vld [vmem:[#allocation2 + $0x2d0] sm:$0xf0] }
  0x21   :  { %v745_v42 = vsel %vm728_vm0, %v617_v29, 0  ;;  %v1480_v43 = vld [vmem:[#allocation2 + $0x298] sm:$0xf]  ;;  %v748_v45 = vsel %vm728_vm0, %v618_v31, 0  ;;  %v751_v46 = vsel %vm728_vm0, %v619_v32, 0  ;;  %v1473_v50 = vor.u32 %v1624_v37, %v1472_v36  ;;  %s1753_s0 = smov [#allocation7]  }
  0x22   :  { %782 = vmatpush.bf16.msra.mxu0 %v1265_v59  ;;  %795 = vmatpush.bf16.msra.mxu1 %v1269_v60  ;;  %v62_v40 = vadd.f32 %v1636_v30, %v57_v33  ;;  %v1625_v44 = vld [vmem:[#allocation2 + $0x2d4] sm:$0xf0]  ;;  %v1617_v47 = vld [vmem:[#allocation2 + $0x29c] sm:$0xf]  ;;  %v1477_v51 = vor.u32 %v1616_v38, %v1474_v39  ;;  %v1408_v52 = vld [vmem:[#allocation2 + $0x210] sm:$0xf] }
  0x23   :  { %808 = vmatpush.bf16.msra.mxu2 %v1273_v0  ;;  %821 = vmatpush.bf16.msra.mxu3 %v1277_v1  ;;  %v1482_v48 = vld [vmem:[#allocation2 + $0x2d8] sm:$0xf0]  ;;  %v1608_v53 = vld [vmem:[#allocation2 + $0x24c] sm:$0xf0]  ;;  %v1481_v54 = vor.u32 %v1625_v44, %v1480_v43  ;;  %v1600_v56 = vld [vmem:[#allocation2 + $0x214] sm:$0xf] }
  0x24   :  { %v1807_v49 = vpack.c.bf16 %v62_v40, %v62_v40  ;;  %v1485_v55 = vor.u32 %v1617_v47, %v1482_v48  ;;  %v1410_v57 = vld [vmem:[#allocation2 + $0x250] sm:$0xf0]  ;;  %v1416_v58 = vld [vmem:[#allocation2 + $0x218] sm:$0xf]  ;;  %v1601_v60 = vld [vmem:[#allocation2 + $0x21c] sm:$0xf]  ;;  %v1409_v62 = vor.u32 %v1608_v53, %v1408_v52 }
  0x25   :  { %v1609_v59 = vld [vmem:[#allocation2 + $0x254] sm:$0xf0]  ;;  %v1418_v61 = vld [vmem:[#allocation2 + $0x258] sm:$0xf0]  ;;  %v1413_v63 = vor.u32 %v1600_v56, %v1410_v57  ;;  %v1344_v0 = vld [vmem:[#allocation2 + $0x190] sm:$0xf] }
  0x26   :  { %783 = vmatpush.bf16.msra.mxu0 %v1201_v12  ;;  %796 = vmatpush.bf16.msra.mxu1 %v1205_v13  ;;  %v1592_v1 = vld [vmem:[#allocation2 + $0x1cc] sm:$0xf0]  ;;  %v1417_v2 = vor.u32 %v1609_v59, %v1416_v58  ;;  %v1421_v3 = vor.u32 %v1601_v60, %v1418_v61  ;;  %v1584_v4 = vld [vmem:[#allocation2 + $0x194] sm:$0xf]  ;;  %v1352_v6 = vld [vmem:[#allocation2 + $0x198] sm:$0xf] }
  0x27   :  { %809 = vmatpush.bf16.msra.mxu2 %v1209_v19  ;;  %822 = vmatpush.bf16.msra.mxu3 %v1213_v20  ;;  %v1346_v5 = vld [vmem:[#allocation2 + $0x1d0] sm:$0xf0]  ;;  %v1593_v7 = vld [vmem:[#allocation2 + $0x1d4] sm:$0xf0]  ;;  %v1585_v8 = vld [vmem:[#allocation2 + $0x19c] sm:$0xf]  ;;  %v1345_v10 = vor.u32 %v1592_v1, %v1344_v0 }
  0x28   :  { %v1354_v9 = vld [vmem:[#allocation2 + $0x1d8] sm:$0xf0]  ;;  %v1349_v11 = vor.u32 %v1584_v4, %v1346_v5  ;;  %v1280_v12 = vld [vmem:[#allocation2 + $0x110] sm:$0xf]  ;;  %v1353_v14 = vor.u32 %v1593_v7, %v1352_v6  ;;  %v1568_v16 = vld [vmem:[#allocation2 + $0x114] sm:$0xf] }
  0x29   :  { %v1576_v13 = vld [vmem:[#allocation2 + $0x14c] sm:$0xf0]  ;;  %v1357_v15 = vor.u32 %v1585_v8, %v1354_v9  ;;  %v1282_v17 = vld [vmem:[#allocation2 + $0x150] sm:$0xf0]  ;;  %v1288_v18 = vld [vmem:[#allocation2 + $0x118] sm:$0xf] }
  0x2a   :  { %784 = vmatpush.bf16.msra.mxu0 %v1137_v26  ;;  %797 = vmatpush.bf16.msra.mxu1 %v1141_v27  ;;  %v1577_v19 = vld [vmem:[#allocation2 + $0x154] sm:$0xf0]  ;;  %v1569_v20 = vld [vmem:[#allocation2 + $0x11c] sm:$0xf]  ;;  %v1216_v22 = vld [vmem:[#allocation2 + $0x90] sm:$0xf]  ;;  %v1281_v23 = vor.u32 %v1576_v13, %v1280_v12  ;;  %v1285_v24 = vor.u32 %v1568_v16, %v1282_v17 }
  0x2b   :  { %810 = vmatpush.bf16.msra.mxu2 %v1145_v34  ;;  %823 = vmatpush.bf16.msra.mxu3 %v1149_v35  ;;  %v1290_v21 = vld [vmem:[#allocation2 + $0x158] sm:$0xf0]  ;;  %v1560_v25 = vld [vmem:[#allocation2 + $0xcc] sm:$0xf0]  ;;  %v1552_v26 = vld [vmem:[#allocation2 + $0x94] sm:$0xf]  ;;  %v1289_v28 = vor.u32 %v1577_v19, %v1288_v18 }
  0x2c   :  { %v164_v27 = vld [vmem:[#allocation2 + $0x320] sm:$0x33]  ;;  %v1293_v29 = vor.u32 %v1569_v20, %v1290_v21  ;;  %v1218_v30 = vld [vmem:[#allocation2 + $0xd0] sm:$0xf0]  ;;  %v1224_v31 = vld [vmem:[#allocation2 + $0x98] sm:$0xf]  ;;  %v1217_v38 = vor.u32 %v1560_v25, %v1216_v22 }
  0x2d   :  { %1518 = vmatmul.msk.bf16.vlgmr.msra.gmra.mxu0 %vm724_vm1, %v1807_v49  ;;  %1519 = vmatmul.msk.bf16.vlgmr.msra.gmra.mxu1 %vm724_vm1, %v1807_v49  ;;  %v165_v32 = vld [vmem:[#allocation2 + $0x328] sm:$0x33]  ;;  %v1561_v33 = vld [vmem:[#allocation2 + $0xd4] sm:$0xf0]  ;;  %v1553_v34 = vld [vmem:[#allocation2 + $0x9c] sm:$0xf]  ;;  %v508_v36 = vunpack.c.l.b16 %v164_v27  ;;  %v509_v37 = vunpack.c.h.b16 %v164_v27  ;;  %v1221_v39 = vor.u32 %v1552_v26, %v1218_v30 }
  0x2e   :  { %830 = vmatpush.bf16.msrb.mxu0 %v742_v41  ;;  %843 = vmatpush.bf16.msrb.mxu1 %v745_v42  ;;  %v1226_v35 = vld [vmem:[#allocation2 + $0xd8] sm:$0xf0]  ;;  %v1152_v40 = vld [vmem:[#allocation2 + $0x10] sm:$0xf]  ;;  %v510_v42 = vunpack.c.l.b16 %v165_v32  ;;  %v511_v43 = vunpack.c.h.b16 %v165_v32  ;;  %v1225_v44 = vor.u32 %v1561_v33, %v1224_v31  ;;  %v1154_v47 = vld [vmem:[#allocation2 + $0x50] sm:$0xf0] }
  0x2f   :  { %856 = vmatpush.bf16.msrb.mxu2 %v748_v45  ;;  %869 = vmatpush.bf16.msrb.mxu3 %v751_v46  ;;  %v1544_v41 = vld [vmem:[#allocation2 + $0x4c] sm:$0xf0]  ;;  %v1229_v45 = vor.u32 %v1553_v34, %v1226_v35  ;;  %v1536_v46 = vld [vmem:[#allocation2 + $0x14] sm:$0xf]  ;;  %v1160_v48 = vld [vmem:[#allocation2 + $0x18] sm:$0xf] }
  0x30   :  { %1520 = vmatmul.msk.bf16.vlgmr.msra.gmra.mxu2 %vm724_vm1, %v1807_v49  ;;  %1521 = vmatmul.msk.bf16.vlgmr.msra.gmra.mxu3 %vm724_vm1, %v1807_v49  ;;  %v1162_v52 = vld [vmem:[#allocation2 + $0x58] sm:$0xf0]  ;;  %v1153_v53 = vor.u32 %v1544_v41, %v1152_v40  ;;  %v1157_v56 = vor.u32 %v1536_v46, %v1154_v47  ;;  %v622_v57 = vpack.c.b16 %v510_v42, %v510_v42  ;;  %v1488_v61 = vld [vmem:[#allocation2 + $0x2a0] sm:$0xf]  ;;  %v1490_v0 = vld [vmem:[#allocation2 + $0x2e0] sm:$0xf0] }
  0x31   :  { %v623_v58 = vpack.c.b16 %v511_v43, %v511_v43  ;;  %v1627_v4 = vld [vmem:[#allocation2 + $0x2e4] sm:$0xf0]  ;;  %v1619_v7 = vld [vmem:[#allocation2 + $0x2ac] sm:$0xf]  ;;  %v1610_v12 = vld [vmem:[#allocation2 + $0x25c] sm:$0xf0] }
  0x32   :  { %831 = vmatpush.bf16.msrb.mxu0 %v1473_v50  ;;  %844 = vmatpush.bf16.msrb.mxu1 %v1477_v51  ;;  %v1545_v50 = vld [vmem:[#allocation2 + $0x54] sm:$0xf0]  ;;  %v1537_v51 = vld [vmem:[#allocation2 + $0x1c] sm:$0xf]  ;;  %v760_v5 = vsel %vm728_vm0, %v622_v57, 0  ;;  %vm996_vm2 = vcmask 654336  }
  0x33   :  { %857 = vmatpush.bf16.msrb.mxu2 %v1481_v54  ;;  %870 = vmatpush.bf16.msrb.mxu3 %v1485_v55  ;;  %v620_v54 = vpack.c.b16 %v508_v36, %v508_v36  ;;  %v621_v55 = vpack.c.b16 %v509_v37, %v509_v37  ;;  %v1161_v59 = vor.u32 %v1545_v50, %v1160_v48  ;;  %v763_v6 = vsel %vm728_vm0, %v623_v58, 0  ;;  %v1498_v8 = vld [vmem:[#allocation2 + $0x2e8] sm:$0xf0]  ;;  %v1426_v16 = vld [vmem:[#allocation2 + $0x260] sm:$0xf0]  ;;  %s1121_s1 = sshll.u32 %s1753_s0, 4  ;;  %s1122_s1 = int_to_ptr.vmem [resolvable:$true] %s1121_s1 }
  0x34   :  { %v1165_v60 = vor.u32 %v1537_v51, %v1162_v52  ;;  %v1432_v17 = vld [vmem:[#allocation2 + $0x228] sm:$0xf]  ;;  %v1603_v19 = vld [vmem:[#allocation2 + $0x22c] sm:$0xf]  ;;  %v1586_v27 = vld [vmem:[#allocation2 + $0x1a4] sm:$0xf] }
  0x35   :  { %v754_v1 = vsel %vm728_vm0, %v620_v54, 0  ;;  %v1611_v18 = vld [vmem:[#allocation2 + $0x264] sm:$0xf0]  ;;  %v1434_v20 = vld [vmem:[#allocation2 + $0x268] sm:$0xf0]  ;;  %s1123_s10 = sshll.u32 %s1938_s5, 4  ;;  %s1124_s10 = int_to_ptr.hbm [resolvable:$true] %s1123_s10 }
  0x36   :  { %832 = vmatpush.bf16.msrb.mxu0 %v1409_v62  ;;  %845 = vmatpush.bf16.msrb.mxu1 %v1413_v63  ;;  %v1626_v62 = vld [vmem:[#allocation2 + $0x2dc] sm:$0xf0]  ;;  %v1618_v63 = vld [vmem:[#allocation2 + $0x2a4] sm:$0xf]  ;;  %v1433_v25 = vor.u32 %v1611_v18, %v1432_v17  ;;  %v1437_v26 = vor.u32 %v1603_v19, %v1434_v20  ;;  %v1595_v30 = vld [vmem:[#allocation2 + $0x1e4] sm:$0xf0] }
  0x37   :  { %858 = vmatpush.bf16.msrb.mxu2 %v1417_v2  ;;  %871 = vmatpush.bf16.msrb.mxu3 %v1421_v3  ;;  %v757_v2 = vsel %vm728_vm0, %v621_v55, 0  ;;  %v1496_v3 = vld [vmem:[#allocation2 + $0x2a8] sm:$0xf]  ;;  %v1489_v9 = vor.u32 %v1626_v62, %v1488_v61  ;;  %v1587_v31 = vld [vmem:[#allocation2 + $0x1ac] sm:$0xf] }
  0x38   :  { %v1497_v13 = vor.u32 %v1627_v4, %v1496_v3  ;;  %v1370_v32 = vld [vmem:[#allocation2 + $0x1e8] sm:$0xf0]  ;;  %v1296_v35 = vld [vmem:[#allocation2 + $0x120] sm:$0xf]  ;;  %v1298_v40 = vld [vmem:[#allocation2 + $0x160] sm:$0xf0] }
  0x39   :  { %v1578_v36 = vld [vmem:[#allocation2 + $0x15c] sm:$0xf0]  ;;  %v1304_v41 = vld [vmem:[#allocation2 + $0x128] sm:$0xf]  ;;  %v1571_v43 = vld [vmem:[#allocation2 + $0x12c] sm:$0xf] }
  0x3a   :  { %833 = vmatpush.bf16.msrb.mxu0 %v1345_v10  ;;  %846 = vmatpush.bf16.msrb.mxu1 %v1349_v11  ;;  %v1493_v10 = vor.u32 %v1618_v63, %v1490_v0  ;;  %v1424_v11 = vld [vmem:[#allocation2 + $0x220] sm:$0xf]  ;;  %v1579_v42 = vld [vmem:[#allocation2 + $0x164] sm:$0xf0]  ;;  %v1297_v46 = vor.u32 %v1578_v36, %v1296_v35  ;;  %v1554_v50 = vld [vmem:[#allocation2 + $0xa4] sm:$0xf] }
  0x3b   :  { %859 = vmatpush.bf16.msrb.mxu2 %v1353_v14  ;;  %872 = vmatpush.bf16.msrb.mxu3 %v1357_v15  ;;  %v1501_v14 = vor.u32 %v1619_v7, %v1498_v8  ;;  %v1602_v15 = vld [vmem:[#allocation2 + $0x224] sm:$0xf]  ;;  %v1425_v21 = vor.u32 %v1610_v12, %v1424_v11  ;;  %v1562_v48 = vld [vmem:[#allocation2 + $0xdc] sm:$0xf0]  ;;  %v166_v51 = vld [vmem:[#allocation2 + $0x330] sm:$0x33]  ;;  %v1305_v52 = vor.u32 %v1579_v42, %v1304_v41 }
  0x3c   :  { %v1429_v22 = vor.u32 %v1602_v15, %v1426_v16  ;;  %v1234_v54 = vld [vmem:[#allocation2 + $0xe0] sm:$0xf0]  ;;  %v1240_v55 = vld [vmem:[#allocation2 + $0xa8] sm:$0xf]  ;;  %v1555_v58 = vld [vmem:[#allocation2 + $0xac] sm:$0xf]  ;;  %v513_v61 = vunpack.c.h.b16 %v166_v51 }
  0x3d   :  { %v1563_v57 = vld [vmem:[#allocation2 + $0xe4] sm:$0xf0]  ;;  %v1237_v63 = vor.u32 %v1554_v50, %v1234_v54  ;;  %v1168_v0 = vld [vmem:[#allocation2 + $0x20] sm:$0xf]  ;;  %v1170_v7 = vld [vmem:[#allocation2 + $0x60] sm:$0xf0] }
  0x3e   :  { %834 = vmatpush.bf16.msrb.mxu0 %v1281_v23  ;;  %847 = vmatpush.bf16.msrb.mxu1 %v1285_v24  ;;  %v1360_v23 = vld [vmem:[#allocation2 + $0x1a0] sm:$0xf]  ;;  %v1241_v4 = vor.u32 %v1563_v57, %v1240_v55  ;;  %v1176_v8 = vld [vmem:[#allocation2 + $0x28] sm:$0xf]  ;;  %v1178_v11 = vld [vmem:[#allocation2 + $0x68] sm:$0xf0] }
  0x3f   :  { %860 = vmatpush.bf16.msrb.mxu2 %v1289_v28  ;;  %873 = vmatpush.bf16.msrb.mxu3 %v1293_v29  ;;  %v1594_v24 = vld [vmem:[#allocation2 + $0x1dc] sm:$0xf0]  ;;  %v1362_v28 = vld [vmem:[#allocation2 + $0x1e0] sm:$0xf0]  ;;  %v1368_v29 = vld [vmem:[#allocation2 + $0x1a8] sm:$0xf] }
  0x40   :  { %v1361_v33 = vor.u32 %v1594_v24, %v1360_v23  ;;  %v1365_v34 = vor.u32 %v1586_v27, %v1362_v28  ;;  %v1369_v37 = vor.u32 %v1595_v30, %v1368_v29  ;;  %v1504_v20 = vld [vmem:[#allocation2 + $0x2b0] sm:$0xf]  ;;  %v1506_v23 = vld [vmem:[#allocation2 + $0x2f0] sm:$0xf0]  ;;  %v1629_v27 = vld [vmem:[#allocation2 + $0x2f4] sm:$0xf0] }
  0x41   :  { %v1621_v30 = vld [vmem:[#allocation2 + $0x2bc] sm:$0xf]  ;;  %v1612_v35 = vld [vmem:[#allocation2 + $0x26c] sm:$0xf0]  ;;  %v1613_v41 = vld [vmem:[#allocation2 + $0x274] sm:$0xf0] }
  0x42   :  { %835 = vmatpush.bf16.msrb.mxu0 %v1217_v38  ;;  %848 = vmatpush.bf16.msrb.mxu1 %v1221_v39  ;;  %v1373_v38 = vor.u32 %v1587_v31, %v1370_v32  ;;  %v1570_v39 = vld [vmem:[#allocation2 + $0x124] sm:$0xf]  ;;  %v1514_v31 = vld [vmem:[#allocation2 + $0x2f8] sm:$0xf0]  ;;  %v1597_v54 = vld [vmem:[#allocation2 + $0x1f4] sm:$0xf0] }
  0x43   :  { %861 = vmatpush.bf16.msrb.mxu2 %v1225_v44  ;;  %874 = vmatpush.bf16.msrb.mxu3 %v1229_v45  ;;  %v1306_v44 = vld [vmem:[#allocation2 + $0x168] sm:$0xf0]  ;;  %v1232_v45 = vld [vmem:[#allocation2 + $0xa0] sm:$0xf]  ;;  %v1301_v47 = vor.u32 %v1570_v39, %v1298_v40  ;;  %v1442_v39 = vld [vmem:[#allocation2 + $0x270] sm:$0xf0] }
  0x44   :  { %v1233_v62 = vor.u32 %v1562_v48, %v1232_v45  ;;  %v1448_v40 = vld [vmem:[#allocation2 + $0x238] sm:$0xf]  ;;  %v1605_v42 = vld [vmem:[#allocation2 + $0x23c] sm:$0xf] }
  0x45   :  { %v1449_v48 = vor.u32 %v1613_v41, %v1448_v40  ;;  %v1589_v55 = vld [vmem:[#allocation2 + $0x1bc] sm:$0xf] }
  0x46   :  { %836 = vmatpush.bf16.msrb.mxu0 %v1153_v53  ;;  %849 = vmatpush.bf16.msrb.mxu1 %v1157_v56  ;;  %v1309_v53 = vor.u32 %v1571_v43, %v1306_v44  ;;  %v167_v56 = vld [vmem:[#allocation2 + $0x338] sm:$0x33] }
  0x47   :  { %862 = vmatpush.bf16.msrb.mxu2 %v1161_v59  ;;  %875 = vmatpush.bf16.msrb.mxu3 %v1165_v60  ;;  %v1242_v59 = vld [vmem:[#allocation2 + $0xe8] sm:$0xf0]  ;;  %v512_v60 = vunpack.c.l.b16 %v166_v51  ;;  %v515_v3 = vunpack.c.h.b16 %v167_v56  ;;  %v1450_v43 = vld [vmem:[#allocation2 + $0x278] sm:$0xf0]  ;;  %v1588_v51 = vld [vmem:[#allocation2 + $0x1b4] sm:$0xf] }
  0x48   :  { %v1453_v50 = vor.u32 %v1605_v42, %v1450_v43 }
  0x49   :  { %1522 = vmatmul.msk.bf16.vlgmr.msrb.gmra.mxu0 %vm724_vm1, %v1807_v49  ;;  %1523 = vmatmul.msk.bf16.vlgmr.msrb.gmra.mxu1 %vm724_vm1, %v1807_v49  ;;  %v627_v17 = vpack.c.b16 %v515_v3, %v515_v3  ;;  %v1573_v3 = vld [vmem:[#allocation2 + $0x13c] sm:$0xf] }
  0x4a   :  { %882 = vmatpush.bf16.msra.mxu0 %v754_v1  ;;  %895 = vmatpush.bf16.msra.mxu1 %v757_v2  ;;  %v1546_v1 = vld [vmem:[#allocation2 + $0x5c] sm:$0xf0]  ;;  %v514_v2 = vunpack.c.l.b16 %v167_v56  ;;  %v1386_v56 = vld [vmem:[#allocation2 + $0x1f8] sm:$0xf0] }
  0x4b   :  { %908 = vmatpush.bf16.msra.mxu2 %v760_v5  ;;  %921 = vmatpush.bf16.msra.mxu3 %v763_v6  ;;  %v1245_v5 = vor.u32 %v1555_v58, %v1242_v59  ;;  %v1538_v6 = vld [vmem:[#allocation2 + $0x24] sm:$0xf]  ;;  %v1169_v12 = vor.u32 %v1546_v1, %v1168_v0  ;;  %v775_v29 = vsel %vm728_vm0, %v627_v17, 0  ;;  %v1312_v59 = vld [vmem:[#allocation2 + $0x130] sm:$0xf] }
  0x4c   :  { %1524 = vmatmul.msk.bf16.vlgmr.msrb.gmra.mxu2 %vm724_vm1, %v1807_v49  ;;  %1525 = vmatmul.msk.bf16.vlgmr.msrb.gmra.mxu3 %vm724_vm1, %v1807_v49  ;;  %v1173_v15 = vor.u32 %v1538_v6, %v1170_v7  ;;  %v626_v16 = vpack.c.b16 %v514_v2, %v514_v2  ;;  %v1314_v0 = vld [vmem:[#allocation2 + $0x170] sm:$0xf0]  ;;  %v1320_v1 = vld [vmem:[#allocation2 + $0x138] sm:$0xf]  ;;  %v1248_v7 = vld [vmem:[#allocation2 + $0xb0] sm:$0xf] }
  0x4d   :  { %v1581_v2 = vld [vmem:[#allocation2 + $0x174] sm:$0xf0] }
  0x4e   :  { %883 = vmatpush.bf16.msra.mxu0 %v1489_v9  ;;  %896 = vmatpush.bf16.msra.mxu1 %v1493_v10  ;;  %v1547_v9 = vld [vmem:[#allocation2 + $0x64] sm:$0xf0]  ;;  %v1539_v10 = vld [vmem:[#allocation2 + $0x2c] sm:$0xf]  ;;  %v772_v28 = vsel %vm728_vm0, %v626_v16, 0 }
  0x4f   :  { %909 = vmatpush.bf16.msra.mxu2 %v1497_v13  ;;  %922 = vmatpush.bf16.msra.mxu3 %v1501_v14  ;;  %v624_v13 = vpack.c.b16 %v512_v60, %v512_v60  ;;  %v625_v14 = vpack.c.b16 %v513_v61, %v513_v61  ;;  %v1177_v18 = vor.u32 %v1547_v9, %v1176_v8  ;;  %v1580_v60 = vld [vmem:[#allocation2 + $0x16c] sm:$0xf0]  ;;  %v1258_v16 = vld [vmem:[#allocation2 + $0xf8] sm:$0xf0] }
  0x50   :  { %v1181_v19 = vor.u32 %v1539_v10, %v1178_v11  ;;  %v1564_v8 = vld [vmem:[#allocation2 + $0xec] sm:$0xf0]  ;;  %v1321_v9 = vor.u32 %v1581_v2, %v1320_v1  ;;  %v1556_v11 = vld [vmem:[#allocation2 + $0xb4] sm:$0xf] }
  0x51   :  { %v766_v24 = vsel %vm728_vm0, %v624_v13, 0  ;;  %v1256_v13 = vld [vmem:[#allocation2 + $0xb8] sm:$0xf]  ;;  %v1249_v17 = vor.u32 %v1564_v8, %v1248_v7 }
  0x52   :  { %884 = vmatpush.bf16.msra.mxu0 %v1425_v21  ;;  %897 = vmatpush.bf16.msra.mxu1 %v1429_v22  ;;  %v1628_v21 = vld [vmem:[#allocation2 + $0x2ec] sm:$0xf0]  ;;  %v1620_v22 = vld [vmem:[#allocation2 + $0x2b4] sm:$0xf] }
  0x53   :  { %910 = vmatpush.bf16.msra.mxu2 %v1433_v25  ;;  %923 = vmatpush.bf16.msra.mxu3 %v1437_v26  ;;  %v769_v25 = vsel %vm728_vm0, %v625_v14, 0  ;;  %v1512_v26 = vld [vmem:[#allocation2 + $0x2b8] sm:$0xf]  ;;  %v1505_v32 = vor.u32 %v1628_v21, %v1504_v20  ;;  %v1548_v20 = vld [vmem:[#allocation2 + $0x6c] sm:$0xf0] }
  0x54   :  { %v1513_v36 = vor.u32 %v1629_v27, %v1512_v26  ;;  %v1565_v14 = vld [vmem:[#allocation2 + $0xf4] sm:$0xf0]  ;;  %v1541_v27 = vld [vmem:[#allocation2 + $0x3c] sm:$0xf] }
  0x55   :  { %v1257_v21 = vor.u32 %v1565_v14, %v1256_v13  ;;  %v1549_v26 = vld [vmem:[#allocation2 + $0x74] sm:$0xf0] }
  0x56   :  { %885 = vmatpush.bf16.msra.mxu0 %v1361_v33  ;;  %898 = vmatpush.bf16.msra.mxu1 %v1365_v34  ;;  %v1509_v33 = vor.u32 %v1620_v22, %v1506_v23  ;;  %v1440_v34 = vld [vmem:[#allocation2 + $0x230] sm:$0xf]  ;;  %v1540_v23 = vld [vmem:[#allocation2 + $0x34] sm:$0xf] }
  0x57   :  { %911 = vmatpush.bf16.msra.mxu2 %v1369_v37  ;;  %924 = vmatpush.bf16.msra.mxu3 %v1373_v38  ;;  %v1517_v37 = vor.u32 %v1621_v30, %v1514_v31  ;;  %v1604_v38 = vld [vmem:[#allocation2 + $0x234] sm:$0xf]  ;;  %v1441_v44 = vor.u32 %v1612_v35, %v1440_v34 }
  0x58   :  { %v1445_v45 = vor.u32 %v1604_v38, %v1442_v39 }
  0x5a   :  { %886 = vmatpush.bf16.msra.mxu0 %v1297_v46  ;;  %899 = vmatpush.bf16.msra.mxu1 %v1301_v47  ;;  %v1376_v46 = vld [vmem:[#allocation2 + $0x1b0] sm:$0xf] }
  0x5b   :  { %912 = vmatpush.bf16.msra.mxu2 %v1305_v52  ;;  %925 = vmatpush.bf16.msra.mxu3 %v1309_v53  ;;  %v1596_v47 = vld [vmem:[#allocation2 + $0x1ec] sm:$0xf0]  ;;  %v1378_v52 = vld [vmem:[#allocation2 + $0x1f0] sm:$0xf0]  ;;  %v1384_v53 = vld [vmem:[#allocation2 + $0x1b8] sm:$0xf] }
  0x5c   :  { %v1377_v57 = vor.u32 %v1596_v47, %v1376_v46  ;;  %v1381_v58 = vor.u32 %v1588_v51, %v1378_v52  ;;  %v1385_v61 = vor.u32 %v1597_v54, %v1384_v53 }
  0x5e   :  { %887 = vmatpush.bf16.msra.mxu0 %v1233_v62  ;;  %900 = vmatpush.bf16.msra.mxu1 %v1237_v63  ;;  %v1389_v62 = vor.u32 %v1589_v55, %v1386_v56  ;;  %v1572_v63 = vld [vmem:[#allocation2 + $0x134] sm:$0xf] }
  0x5f   :  { %913 = vmatpush.bf16.msra.mxu2 %v1241_v4  ;;  %926 = vmatpush.bf16.msra.mxu3 %v1245_v5  ;;  %v1322_v4 = vld [vmem:[#allocation2 + $0x178] sm:$0xf0]  ;;  %v1313_v5 = vor.u32 %v1580_v60, %v1312_v59  ;;  %v1317_v6 = vor.u32 %v1572_v63, %v1314_v0 }
  0x60   :  { %v1325_v10 = vor.u32 %v1573_v3, %v1322_v4 }
  0x62   :  { %888 = vmatpush.bf16.msra.mxu0 %v1169_v12  ;;  %901 = vmatpush.bf16.msra.mxu1 %v1173_v15  ;;  %v1250_v12 = vld [vmem:[#allocation2 + $0xf0] sm:$0xf0]  ;;  %v1557_v15 = vld [vmem:[#allocation2 + $0xbc] sm:$0xf] }
  0x63   :  { %914 = vmatpush.bf16.msra.mxu2 %v1177_v18  ;;  %927 = vmatpush.bf16.msra.mxu3 %v1181_v19  ;;  %v1253_v18 = vor.u32 %v1556_v11, %v1250_v12  ;;  %v1184_v19 = vld [vmem:[#allocation2 + $0x30] sm:$0xf]  ;;  %v1261_v22 = vor.u32 %v1557_v15, %v1258_v16 }
  0x65   :  { %1526 = vmatmul.msk.bf16.vlgmr.msra.gmra.mxu0 %vm724_vm1, %v1807_v49  ;;  %1527 = vmatmul.msk.bf16.vlgmr.msra.gmra.mxu1 %vm724_vm1, %v1807_v49 }
  0x66   :  { %934 = vmatpush.bf16.msrb.mxu0 %v766_v24  ;;  %947 = vmatpush.bf16.msrb.mxu1 %v769_v25  ;;  %v1186_v24 = vld [vmem:[#allocation2 + $0x70] sm:$0xf0]  ;;  %v1192_v25 = vld [vmem:[#allocation2 + $0x38] sm:$0xf] }
  0x67   :  { %960 = vmatpush.bf16.msrb.mxu2 %v772_v28  ;;  %973 = vmatpush.bf16.msrb.mxu3 %v775_v29  ;;  %v1194_v28 = vld [vmem:[#allocation2 + $0x78] sm:$0xf0]  ;;  %v1185_v29 = vor.u32 %v1548_v20, %v1184_v19  ;;  %v1189_v30 = vor.u32 %v1540_v23, %v1186_v24  ;;  %v1193_v31 = vor.u32 %v1549_v26, %v1192_v25 }
  0x68   :  { %1528 = vmatmul.msk.bf16.vlgmr.msra.gmra.mxu2 %vm724_vm1, %v1807_v49  ;;  %1529 = vmatmul.msk.bf16.vlgmr.msra.gmra.mxu3 %vm724_vm1, %v1807_v49 }
  0x6a   :  { %935 = vmatpush.bf16.msrb.mxu0 %v1505_v32  ;;  %948 = vmatpush.bf16.msrb.mxu1 %v1509_v33  ;;  %v1197_v32 = vor.u32 %v1541_v27, %v1194_v28 }
  0x6b   :  { %961 = vmatpush.bf16.msrb.mxu2 %v1513_v36  ;;  %974 = vmatpush.bf16.msrb.mxu3 %v1517_v37 }
  0x6e   :  { %936 = vmatpush.bf16.msrb.mxu0 %v1441_v44  ;;  %949 = vmatpush.bf16.msrb.mxu1 %v1445_v45 }
  0x6f   :  { %962 = vmatpush.bf16.msrb.mxu2 %v1449_v48  ;;  %975 = vmatpush.bf16.msrb.mxu3 %v1453_v50 }
  0x72   :  { %937 = vmatpush.bf16.msrb.mxu0 %v1377_v57  ;;  %950 = vmatpush.bf16.msrb.mxu1 %v1381_v58  ;;  %v168_v57 = vld [vmem:[#allocation5] sm:$0xff] }
  0x73   :  { %963 = vmatpush.bf16.msrb.mxu2 %v1385_v61  ;;  %976 = vmatpush.bf16.msrb.mxu3 %v1389_v62  ;;  %v172_v58 = vperm.slane %v168_v57, 0  ;;  %v173_v59 = vperm.slane %v168_v57, 1  ;;  %v176_v60 = vperm.slane %v168_v57, 4  ;;  %v169_v61 = vld [vmem:[#allocation5 + $0x8] sm:$0xff]  ;;  %v177_v62 = vperm.slane %v168_v57, 5 }
  0x74   :  { %v174_v63 = vperm.slane %v168_v57, 2  ;;  %v178_v0 = vperm.slane %v168_v57, 6  ;;  %v175_v1 = vperm.slane %v168_v57, 3  ;;  %v179_v2 = vperm.slane %v168_v57, 7 }
  0x75   :  { %v180_v3 = vperm.slane %v169_v61, 0  ;;  %v181_v4 = vperm.slane %v169_v61, 1  ;;  %v182_v8 = vperm.slane %v169_v61, 2  ;;  %v183_v12 = vperm.slane %v169_v61, 3 }
  0x76   :  { %938 = vmatpush.bf16.msrb.mxu0 %v1313_v5  ;;  %951 = vmatpush.bf16.msrb.mxu1 %v1317_v6  ;;  %v184_v13 = vperm.slane %v169_v61, 4  ;;  %v185_v14 = vperm.slane %v169_v61, 5  ;;  %v186_v23 = vperm.slane %v169_v61, 6  ;;  %v187_v24 = vperm.slane %v169_v61, 7 }
  0x77   :  { %964 = vmatpush.bf16.msrb.mxu2 %v1321_v9  ;;  %977 = vmatpush.bf16.msrb.mxu3 %v1325_v10 }
  0x7a   :  { %939 = vmatpush.bf16.msrb.mxu0 %v1249_v17  ;;  %952 = vmatpush.bf16.msrb.mxu1 %v1253_v18 }
  0x7b   :  { %965 = vmatpush.bf16.msrb.mxu2 %v1257_v21  ;;  %978 = vmatpush.bf16.msrb.mxu3 %v1261_v22 }
  0x7e   :  { %940 = vmatpush.bf16.msrb.mxu0 %v1185_v29  ;;  %953 = vmatpush.bf16.msrb.mxu1 %v1189_v30 }
  0x7f   :  { %966 = vmatpush.bf16.msrb.mxu2 %v1193_v31  ;;  %979 = vmatpush.bf16.msrb.mxu3 %v1197_v32 }
  0x81   :  { %1530 = vmatmul.msk.bf16.vlgmr.msrb.gmra.mxu0 %vm724_vm1, %v1807_v49  ;;  %1531 = vmatmul.msk.bf16.vlgmr.msrb.gmra.mxu1 %vm724_vm1, %v1807_v49 }
  0x82   :  { %1532 = vmatmul.msk.bf16.vlgmr.msrb.gmra.mxu2 %vm724_vm1, %v1807_v49  ;;  %1533 = vmatmul.msk.bf16.vlgmr.msrb.gmra.mxu3 %vm724_vm1, %v1807_v49 }
  0xaa   :  { %v786_v33 = vpop.f32.mrf.mxu0  ;;  %v799_v34 = vpop.f32.mrf.mxu1 }
  0xab   :  { %v787_v5 = vadd.f32 %v786_v33, %v172_v58  ;;  %v800_v6 = vadd.f32 %v799_v34, %v173_v59 }
  0xb2   :  { %v788_v37 = vpop.f32.mrf.mxu0  ;;  %v801_v38 = vpop.f32.mrf.mxu1 }
  0xb3   :  { %v812_v35 = vpop.f32.mrf.mxu2  ;;  %v825_v36 = vpop.f32.mrf.mxu3 }
  0xb4   :  { %v813_v15 = vadd.f32 %v812_v35, %v174_v63  ;;  %v826_v17 = vadd.f32 %v825_v36, %v175_v1 }
  0xbb   :  { %v814_v39 = vpop.f32.mrf.mxu2  ;;  %v827_v40 = vpop.f32.mrf.mxu3 }
  0xc6   :  { %v838_v41 = vpop.f32.mrf.mxu0  ;;  %v851_v42 = vpop.f32.mrf.mxu1 }
  0xc7   :  { %v839_v7 = vadd.f32 %v838_v41, %v176_v60  ;;  %v852_v11 = vadd.f32 %v851_v42, %v177_v62 }
  0xc9   :  { %v985_v21 = vmax.f32 %v787_v5, %v839_v7  ;;  %v986_v25 = vmax.f32 %v800_v6, %v852_v11 }
  0xce   :  { %v840_v45 = vpop.f32.mrf.mxu0  ;;  %v853_v46 = vpop.f32.mrf.mxu1 }
  0xcf   :  { %v864_v43 = vpop.f32.mrf.mxu2  ;;  %v877_v44 = vpop.f32.mrf.mxu3 }
  0xd0   :  { %v865_v16 = vadd.f32 %v864_v43, %v178_v0  ;;  %v1849_v18 = vadd.f32 %v877_v44, %v179_v2 }
  0xd2   :  { %v987_v29 = vmax.f32 %v813_v15, %v865_v16  ;;  %v988_v30 = vmax.f32 %v826_v17, %v1849_v18 }
  0xd7   :  { %v866_v47 = vpop.f32.mrf.mxu2  ;;  %v879_v48 = vpop.f32.mrf.mxu3 }
  0xe2   :  { %v890_v50 = vpop.f32.mrf.mxu0  ;;  %v903_v51 = vpop.f32.mrf.mxu1 }
  0xe3   :  { %v1851_v19 = vadd.f32 %v890_v50, %v180_v3  ;;  %v1853_v20 = vadd.f32 %v903_v51, %v181_v4 }
  0xe5   :  { %v989_v31 = vmax.f32 %v985_v21, %v1851_v19  ;;  %v990_v32 = vmax.f32 %v986_v25, %v1853_v20 }
  0xea   :  { %v892_v53 = vpop.f32.mrf.mxu0  ;;  %v905_v54 = vpop.f32.mrf.mxu1 }
  0xeb   :  { %v916_v52 = vpop.f32.mrf.mxu2  ;;  %v929_v49 = vpop.f32.mrf.mxu3 }
  0xec   :  { %v1855_v22 = vadd.f32 %v916_v52, %v182_v8  ;;  %v1857_v26 = vadd.f32 %v929_v49, %v183_v12 }
  0xee   :  { %v991_v35 = vmax.f32 %v987_v29, %v1855_v22  ;;  %v992_v40 = vmax.f32 %v988_v30, %v1857_v26 }
  0xf3   :  { %v931_v55 = vpop.f32.mrf.mxu3  ;;  %v918_v56 = vpop.f32.mrf.mxu2 }
  0xfe   :  { %v942_v9 = vpop.f32.mrf.mxu0  ;;  %v955_v10 = vpop.f32.mrf.mxu1 }
  0xff   :  { %v1859_v27 = vadd.f32 %v942_v9, %v184_v13  ;;  %v1861_v28 = vadd.f32 %v955_v10, %v185_v14 }
 0x101   :  { %v993_v41 = vmax.f32 %v989_v31, %v1859_v27  ;;  %v994_v42 = vmax.f32 %v990_v32, %v1861_v28 }
 0x103   :  { %v999_v46 = vmax.f32 %v993_v41, %v994_v42 }
 0x105   :  { %v968_v33 = vpop.f32.mrf.mxu2  ;;  %v981_v34 = vpop.f32.mrf.mxu3 }
 0x106   :  { %v1867_v36 = vadd.f32 %v968_v33, %v186_v23  ;;  %v1869_v37 = vadd.f32 %v981_v34, %v187_v24  ;;  %v944_v38 = vpop.f32.mrf.mxu0  ;;  %v957_v39 = vpop.f32.mrf.mxu1 }
 0x108   :  { %v995_v43 = vmax.f32 %v991_v35, %v1867_v36  ;;  %v997_v44 = vsel %vm996_vm2, %v1869_v37, -inf }
 0x109   :  { %v998_v45 = vmax.f32 %v992_v40, %v997_v44 }
 0x10b   :  { %v1000_v47 = vmax.f32 %v995_v43, %v998_v45 }
 0x10d   :  { %v970_v48 = vpop.f32.mrf.mxu2  ;;  %v983_v50 = vpop.f32.mrf.mxu3  ;;  %v1001_v51 = vmax.f32 %v999_v46, %v1000_v47 }
 0x10f   :  { %1002 = vmax.xlane.f32.xlu0 %v1001_v51 }
 0x182   :  { %v1877_v52 = vpop.xlane.xlu0 %1002 }
 0x183   :  { %v1004_v49 = vsub.f32 %v787_v5, %v1877_v52  ;;  %v1005_v53 = vsub.f32 %v800_v6, %v1877_v52  ;;  %v1006_v54 = vsub.f32 %v813_v15, %v1877_v52  ;;  %v1007_v55 = vsub.f32 %v826_v17, %v1877_v52 }
 0x184   :  { %v1008_v58 = vsub.f32 %v839_v7, %v1877_v52  ;;  %v1009_v60 = vsub.f32 %v852_v11, %v1877_v52  ;;  %v1010_v62 = vsub.f32 %v865_v16, %v1877_v52  ;;  %v1011_v0 = vsub.f32 %v1849_v18, %v1877_v52 }
 0x185   :  { %v1020_v56 = vmul.f32 1.442695, %v1004_v49  ;;  %v1022_v57 = vmul.f32 1.442695, %v1005_v53  ;;  %v1024_v59 = vmul.f32 1.442695, %v1006_v54  ;;  %v1012_v4 = vsub.f32 %v1851_v19, %v1877_v52 }
 0x186   :  { %v1026_v61 = vmul.f32 1.442695, %v1007_v55  ;;  %v1028_v63 = vmul.f32 1.442695, %v1008_v58  ;;  %v1030_v1 = vmul.f32 1.442695, %v1009_v60  ;;  %v1013_v8 = vsub.f32 %v1853_v20, %v1877_v52 }
 0x187   :  { %1637 = vpow2.f32 %v1020_v56  ;;  %v1032_v5 = vmul.f32 1.442695, %v1010_v62  ;;  %v1034_v9 = vmul.f32 1.442695, %v1011_v0  ;;  %v1014_v12 = vsub.f32 %v1855_v22, %v1877_v52 }
 0x188   :  { %1639 = vpow2.f32 %v1022_v57  ;;  %v1036_v13 = vmul.f32 1.442695, %v1012_v4  ;;  %v1015_v16 = vsub.f32 %v1857_v26, %v1877_v52  ;;  %v1038_v17 = vmul.f32 1.442695, %v1013_v8 }
 0x189   :  { %1641 = vpow2.f32 %v1024_v59  ;;  %v1016_v20 = vsub.f32 %v1859_v27, %v1877_v52  ;;  %v1040_v21 = vmul.f32 1.442695, %v1014_v12  ;;  %v1017_v24 = vsub.f32 %v1861_v28, %v1877_v52 }
 0x18a   :  { %1643 = vpow2.f32 %v1026_v61  ;;  %v1042_v25 = vmul.f32 1.442695, %v1015_v16  ;;  %v1019_v26 = vsub.f32 %v1869_v37, %v1877_v52  ;;  %v1018_v31 = vsub.f32 %v1867_v36, %v1877_v52 }
 0x18b   :  { %1645 = vpow2.f32 %v1028_v63  ;;  %v1044_v27 = vmul.f32 1.442695, %v1016_v20  ;;  %v1046_v34 = vmul.f32 1.442695, %v1017_v24 }
 0x18c   :  { %1647 = vpow2.f32 %v1030_v1  ;;  %v1050_v35 = vmul.f32 1.442695, %v1019_v26  ;;  %v1048_v28 = vmul.f32 1.442695, %v1018_v31 }
 0x18d   :  { %v1888_v2 = vpop.eup %1637  ;;  %1649 = vpow2.f32 %v1032_v5 }
 0x18e   :  { %v1890_v3 = vpop.eup %1639  ;;  %1651 = vpow2.f32 %v1034_v9 }
 0x18f   :  { %v1052_v6 = vadd.f32 %v1890_v3, %v1888_v2  ;;  %v1896_v7 = vpop.eup %1641  ;;  %1653 = vpow2.f32 %v1036_v13 }
 0x190   :  { %v1901_v11 = vpop.eup %1643  ;;  %1655 = vpow2.f32 %v1038_v17 }
 0x191   :  { %v1053_v10 = vadd.f32 %v1896_v7, %v1052_v6  ;;  %v1906_v15 = vpop.eup %1645  ;;  %1657 = vpow2.f32 %v1040_v21 }
 0x192   :  { %v1911_v19 = vpop.eup %1647  ;;  %1659 = vpow2.f32 %v1042_v25 }
 0x193   :  { %v1054_v14 = vadd.f32 %v1901_v11, %v1053_v10  ;;  %v1650_v23 = vpop.eup %1649  ;;  %1661 = vpow2.f32 %v1044_v27 }
 0x194   :  { %v1652_v30 = vpop.eup %1651  ;;  %1663 = vpow2.f32 %v1046_v34 }
 0x195   :  { %v1055_v18 = vadd.f32 %v1906_v15, %v1054_v14  ;;  %v1654_v33 = vpop.eup %1653  ;;  %1665 = vpow2.f32 %v1050_v35 }
 0x196   :  { %v1656_v39 = vpop.eup %1655  ;;  %1667 = vpow2.f32 %v1048_v28 }
 0x197   :  { %v1056_v22 = vadd.f32 %v1911_v19, %v1055_v18  ;;  %v1658_v41 = vpop.eup %1657 }
 0x198   :  { %v1660_v42 = vpop.eup %1659 }
 0x199   :  { %v1057_v29 = vadd.f32 %v1650_v23, %v1056_v22  ;;  %v1662_v36 = vpop.eup %1661 }
 0x19a   :  { %v1664_v45 = vpop.eup %1663 }
 0x19b   :  { %v1058_v32 = vadd.f32 %v1652_v30, %v1057_v29  ;;  %v1666_v46 = vpop.eup %1665 }
 0x19c   :  { %v1668_v48 = vpop.eup %1667  ;;  %v1066_v51 = vsel %vm996_vm2, %v1666_v46, 0.0 }
 0x19d   :  { %v1059_v38 = vadd.f32 %v1654_v33, %v1058_v32 }
 0x19f   :  { %v1060_v40 = vadd.f32 %v1656_v39, %v1059_v38 }
 0x1a1   :  { %v1061_v37 = vadd.f32 %v1658_v41, %v1060_v40 }
 0x1a3   :  { %v1062_v43 = vadd.f32 %v1660_v42, %v1061_v37 }
 0x1a5   :  { %v1063_v44 = vadd.f32 %v1662_v36, %v1062_v43 }
 0x1a7   :  { %v1064_v47 = vadd.f32 %v1664_v45, %v1063_v44 }
 0x1a9   :  { %v1065_v50 = vadd.f32 %v1668_v48, %v1064_v47 }
 0x1ab   :  { %v1067_v52 = vadd.f32 %v1066_v51, %v1065_v50 }
 0x1ad   :  { %1068 = vadd.xlane.f32.xlu0 %v1067_v52 }
 0x220   :  { %v1069_v49 = vpop.xlane.xlu0 %1068 }
 0x221   :  { %1669 = vrcp.f32 %v1069_v49  ;;  %v1081_v56 = vand.u32 2147483648, %v1069_v49  ;;  %v1079_v58 = vand.u32 2147483647, %v1069_v49  ;;  %vm1075_vm4 = vweird.f32 %v1069_v49 }
 0x223   :  { %v1082_v60 = vor.u32 1.1754944e-38, %v1081_v56  ;;  %vm1080_vm6 = vcmp.eq.f32.partialorder %v1079_v58, 8.507059e+37 }
 0x227   :  { %v1670_v53 = vpop.eup %1669 }
 0x228   :  { %v1071_v54 = vmul.f32 %v1670_v53, %v1069_v49  ;;  %vm1076_vm3 = vweird.f32 %v1670_v53 }
 0x229   :  { %vm1077_vm5 = vmor %vm1075_vm4, %vm1076_vm3 }
 0x22a   :  { %v1072_v55 = vsub.f32 1.0, %v1071_v54 }
 0x22c   :  { %v1073_v57 = vmul.f32 %v1670_v53, %v1072_v55 }
 0x22e   :  { %v1074_v59 = vadd.f32 %v1670_v53, %v1073_v57 }
 0x230   :  { %v1078_v61 = vsel %vm1077_vm5, %v1670_v53, %v1074_v59 }
 0x231   :  { %v1083_v62 = vsel %vm1080_vm6, %v1082_v60, %v1078_v61 }
 0x232   :  { %v1084_v63 = vmul.f32 %v1888_v2, %v1083_v62  ;;  %v1085_v0 = vmul.f32 %v1890_v3, %v1083_v62  ;;  %v1086_v1 = vmul.f32 %v1896_v7, %v1083_v62  ;;  %v1087_v4 = vmul.f32 %v1901_v11, %v1083_v62 }
 0x233   :  { %v1088_v5 = vmul.f32 %v1906_v15, %v1083_v62  ;;  %v1089_v6 = vmul.f32 %v1911_v19, %v1083_v62  ;;  %v1090_v8 = vmul.f32 %v1650_v23, %v1083_v62  ;;  %v1091_v9 = vmul.f32 %v1652_v30, %v1083_v62 }
 0x234   :  { %1100 = vst [vmem:[#allocation7] sm:$0xff] %v1084_v63  ;;  %v1092_v10 = vmul.f32 %v1654_v33, %v1083_v62  ;;  %v1093_v12 = vmul.f32 %v1656_v39, %v1083_v62  ;;  %v1094_v2 = vmul.f32 %v1658_v41, %v1083_v62  ;;  %v1095_v3 = vmul.f32 %v1660_v42, %v1083_v62 }
 0x235   :  { %1101 = vst [vmem:[#allocation7 + $0x8] sm:$0xff] %v1085_v0  ;;  %v1096_v7 = vmul.f32 %v1662_v36, %v1083_v62  ;;  %v1097_v11 = vmul.f32 %v1664_v45, %v1083_v62  ;;  %v1098_v13 = vmul.f32 %v1668_v48, %v1083_v62  ;;  %v1099_v14 = vmul.f32 %v1666_v46, %v1083_v62 }
 0x236   :  { %1102 = vst [vmem:[#allocation7 + $0x10] sm:$0xff] %v1086_v1 }
 0x237   :  { %1103 = vst [vmem:[#allocation7 + $0x18] sm:$0xff] %v1087_v4 }
 0x238   :  { %1104 = vst [vmem:[#allocation7 + $0x20] sm:$0xff] %v1088_v5 }
 0x239   :  { %1105 = vst [vmem:[#allocation7 + $0x28] sm:$0xff] %v1089_v6 }
 0x23a   :  { %1106 = vst [vmem:[#allocation7 + $0x30] sm:$0xff] %v1090_v8 }
 0x23b   :  { %1107 = vst [vmem:[#allocation7 + $0x38] sm:$0xff] %v1091_v9 }
 0x23c   :  { %1108 = vst [vmem:[#allocation7 + $0x40] sm:$0xff] %v1092_v10 }
 0x23d   :  { %1109 = vst [vmem:[#allocation7 + $0x48] sm:$0xff] %v1093_v12 }
 0x23e   :  { %1110 = vst [vmem:[#allocation7 + $0x50] sm:$0xff] %v1094_v2 }
 0x23f   :  { %1111 = vst [vmem:[#allocation7 + $0x58] sm:$0xff] %v1095_v3 }
 0x240   :  { %1112 = vst [vmem:[#allocation7 + $0x60] sm:$0xff] %v1096_v7 }
 0x241   :  { %1113 = vst [vmem:[#allocation7 + $0x68] sm:$0xff] %v1097_v11 }
 0x242   :  { %1114 = vst [vmem:[#allocation7 + $0x70] sm:$0xff] %v1098_v13 }
 0x243   :  { %1115 = vst.msk [vmem:[#allocation7 + $0x78] sm:$0xff] %vm996_vm2, %v1099_v14 }
 0x244   :  { %1126 = dma.vmem_to_hbm [thread:$0]  %s1122_s1, 2048, %s1124_s10, [#allocation4]  }
 0x245   :  { %1747 = dma.done.wait [#allocation4], 2048  }
 0x246   :  { %1748 = vsyncadd [#allocation4], 4294965248 }
 0x247   :  { %1131 = vsyncpa [#allocation3], 1 }
 0x248   :  { %1132 = vsyncpa [#allocation6], 1 }
 0x249   :  { %1133 = vsyncpa [#allocation4], 1 }

</bundles_post_ra>
